<compile_context>
chip_gen: v7x
topology: tpu7x:2x2x1
jax: 0.10.0
libtpu: 0.0.40
codegen_flags: <defaults>
</compile_context>

<pallas_src>
import jax
import jax.numpy as jnp
from jax.experimental import pallas as pl
from jax.experimental.pallas import tpu as pltpu

EPS = 1e-5


def _round_up(x, m):
    return ((x + m - 1) // m) * m


def _vmem_limit_bytes():
    """Generation-aware scoped-VMEM limit.

    v5e/v6e have 128 MiB physical VMEM -> use 64 MiB; v7x has 64 MiB -> use
    48 MiB.  Falls back to 48 MiB if the query is unavailable.
    """
    try:
        info = pltpu.get_tpu_info()
        cap = int(getattr(info, "vmem_capacity_bytes", 64 * 1024 * 1024))
    except Exception:  # pragma: no cover - not on TPU / API unavailable
        cap = 64 * 1024 * 1024
    return min(64 * 1024 * 1024, (cap * 3) // 4)


_ROW_TILE_CANDIDATES = (1024, 768, 512, 384, 256, 192, 128, 96, 64, 32, 16, 8)


def _pick_row_tile(rows, per_row_bytes, fixed_bytes, budget_bytes, requested):
    """Largest row tile (multiple of 8) that fits the VMEM budget."""
    rows8 = _round_up(max(rows, 1), 8)
    cap = min(requested, rows8)
    for tm in _ROW_TILE_CANDIDATES:
        if tm > cap:
            continue
        if fixed_bytes + tm * per_row_bytes <= budget_bytes:
            return tm
    return 8


# ----------------------- standalone tiled LayerNorm --------------------------
# Used when the wrapped `fn` is an arbitrary callable (no fusion possible).
def _layernorm_kernel(x_ref, g_ref, b_ref, o_ref):
    x = x_ref[...].astype(jnp.float32)
    h = x.shape[-1]
    s1 = jnp.sum(x, axis=-1, keepdims=True)
    s2 = jnp.sum(x * x, axis=-1, keepdims=True)
    mean = s1 * (1.0 / h)
    var = jnp.maximum(s2 * (1.0 / h) - mean * mean, 0.0)  # clamp: cancellation
    y = (x - mean) * jax.lax.rsqrt(var + EPS)
    y = y * g_ref[...].astype(jnp.float32) + b_ref[...].astype(jnp.float32)
    o_ref[...] = y.astype(o_ref.dtype)


def layernorm(x, gamma, beta, *, block_rows=512):
    """x: [B, S, H]; gamma/beta: [H]. Normalizes over the last axis."""
    B, S, H = x.shape
    rows = B * S

    vmem_limit = _vmem_limit_bytes()
    budget = (vmem_limit * 4) // 5  # leave headroom inside the scoped limit
    x_bytes = jnp.dtype(x.dtype).itemsize
    per_row = (H * x_bytes * 2      # input tile (double-buffered)
               + H * x_bytes * 2    # output tile (double-buffered)
               + 3 * H * 4)         # f32 temporaries (x, x*x, y)
    tm = _pick_row_tile(rows, per_row, 0, budget, block_rows)

    x2 = x.reshape(rows, H)                  # no activation padding
    g2 = gamma.reshape(1, H).astype(jnp.float32)
    b2 = beta.reshape(1, H).astype(jnp.float32)

    out = pl.pallas_call(
        _layernorm_kernel,
        out_shape=jax.ShapeDtypeStruct((rows, H), x.dtype),
        grid_spec=pltpu.PrefetchScalarGridSpec(
            num_scalar_prefetch=0,
            grid=(pl.cdiv(rows, tm),),       # partial last row block is masked
            in_specs=[
                pl.BlockSpec((tm, H), lambda i: (i, 0)),
                pl.BlockSpec((1, H), lambda i: (0, 0)),   # gamma, resident
                pl.BlockSpec((1, H), lambda i: (0, 0)),   # beta, resident
            ],
            out_specs=pl.BlockSpec((tm, H), lambda i: (i, 0)),
        ),
        compiler_params=pltpu.CompilerParams(
            dimension_semantics=("parallel",),
            vmem_limit_bytes=vmem_limit,
        ),
    )(x2, g2, b2)
    return out.reshape(B, S, H)


# -------------------- fused LayerNorm + Linear (PreNorm(Linear)) -------------
def _prenorm_linear_kernel(x_ref, g_ref, b_ref, w_ref, bias_ref, o_ref, xn_ref):
    # Normalize the row tile once per row block; cache it (in the matmul
    # compute dtype, bf16 by default) in a VMEM scratch so the normalized
    # activation never touches HBM and is reused across all output column
    # blocks (j axis).  The j axis therefore MUST stay sequential ("arbitrary").
    @pl.when(pl.program_id(1) == 0)
    def _():
        x = x_ref[...].astype(jnp.float32)
        h = x.shape[-1]
        s1 = jnp.sum(x, axis=-1, keepdims=True)
        s2 = jnp.sum(x * x, axis=-1, keepdims=True)
        mean = s1 * (1.0 / h)
        var = jnp.maximum(s2 * (1.0 / h) - mean * mean, 0.0)
        y = (x - mean) * jax.lax.rsqrt(var + EPS)
        y = y * g_ref[...].astype(jnp.float32) + b_ref[...].astype(jnp.float32)
        xn_ref[...] = y.astype(xn_ref.dtype)

    acc = jnp.dot(xn_ref[...], w_ref[...], preferred_element_type=jnp.float32)
    acc = acc + bias_ref[...].astype(jnp.float32)
    o_ref[...] = acc.astype(o_ref.dtype)


def prenorm_linear(x, gamma, beta, w, b, *, block_rows=1024, block_cols=256,
                   compute_dtype=jnp.bfloat16):
    """Fused LayerNorm(x) @ W + b.  x: [B,S,H], w: [H,Hout], b: [Hout]."""
    B, S, H = x.shape
    Hout = w.shape[1]
    rows = B * S

    vmem_limit = _vmem_limit_bytes()
    budget = (vmem_limit * 4) // 5

    x_bytes = jnp.dtype(x.dtype).itemsize
    cmp_bytes = jnp.dtype(compute_dtype).itemsize
    out_bytes = jnp.dtype(x.dtype).itemsize

    tn = min(block_cols, _round_up(Hout, 128))   # lane-dense output tile
    hout_p = _round_up(Hout, tn)

    # VMEM budget: double-buffered blocks + cached normalized tile + the f32
    # temporaries materialized by the LayerNorm branch.
    fixed = (H * tn * cmp_bytes * 2      # W column block (double-buffered)
             + tn * 4 * 2                # bias block
             + 2 * H * 4 * 2)            # gamma/beta
    per_row = (H * x_bytes * 2           # x tile (double-buffered)
               + H * cmp_bytes           # xn scratch (single buffer)
               + tn * out_bytes * 2      # output tile (double-buffered)
               + 3 * H * 4)              # f32 LN temporaries (x, x*x, y)
    tm = _pick_row_tile(rows, per_row, fixed, budget, block_rows)

    x2 = x.reshape(rows, H)              # no activation padding (partial tiles)
    g2 = gamma.reshape(1, H).astype(jnp.float32)
    b2 = beta.reshape(1, H).astype(jnp.float32)

    # Pre-cast W to the (bf16) MXU compute dtype; pad columns only when the
    # output width is not a multiple of the lane-dense tile (small, one-time).
    w_c = w.astype(compute_dtype)
    bias_c = b.astype(jnp.float32)
    if hout_p != Hout:
        w_c = jnp.pad(w_c, ((0, 0), (0, hout_p - Hout)))
        bias_c = jnp.pad(bias_c, ((0, hout_p - Hout),))
    bias2 = bias_c.reshape(1, hout_p)

    out = pl.pallas_call(
        _prenorm_linear_kernel,
        out_shape=jax.ShapeDtypeStruct((rows, hout_p), x.dtype),
        grid_spec=pltpu.PrefetchScalarGridSpec(
            num_scalar_prefetch=0,
            grid=(pl.cdiv(rows, tm), hout_p // tn),
            in_specs=[
                pl.BlockSpec((tm, H), lambda i, j: (i, 0)),   # x tile, const over j
                pl.BlockSpec((1, H), lambda i, j: (0, 0)),    # gamma, resident
                pl.BlockSpec((1, H), lambda i, j: (0, 0)),    # beta, resident
                pl.BlockSpec((H, tn), lambda i, j: (0, j)),   # W column block
                pl.BlockSpec((1, tn), lambda i, j: (0, j)),   # bias column block
            ],
            out_specs=pl.BlockSpec((tm, tn), lambda i, j: (i, j)),
            scratch_shapes=[pltpu.VMEM((tm, H), compute_dtype)],  # cached LN tile
        ),
        compiler_params=pltpu.CompilerParams(
            # rows are independent -> parallel (megacore sharding);
            # column axis reuses the cached normalized tile -> MUST be arbitrary.
            dimension_semantics=("parallel", "arbitrary"),
            vmem_limit_bytes=vmem_limit,
        ),
    )(x2, g2, b2, w_c, bias2)

    if hout_p != Hout:
        out = out[:, :Hout]
    return out.reshape(B, S, Hout)


# ------------------------------- PreNorm glue --------------------------------
class Linear:
    """The wrapped `fn` used in the demo (deterministic Linear)."""

    def __init__(self, w, b):
        self.w = w
        self.b = b

    def __call__(self, x):
        # Generic (non-fused) fallback; the fused Pallas path is taken via PreNorm.
        return jnp.einsum("bsh,hk->bsk", x, self.w) + self.b


class PreNorm:
    """JAX/Pallas equivalent of the PyTorch PreNorm module."""

    def __init__(self, hidden_dim, fn):
        # nn.LayerNorm(hidden_dim) default init: weight=1, bias=0.
        self.gamma = jnp.ones((hidden_dim,), jnp.float32)
        self.beta = jnp.zeros((hidden_dim,), jnp.float32)
        self.fn = fn

    def __call__(self, x, **kwargs):
        if isinstance(self.fn, Linear) and not kwargs:
            # Fused LayerNorm+Linear kernel: no HBM round-trip of the
            # normalized activation; bf16 MXU matmul with f32 accumulation.
            return prenorm_linear(x, self.gamma, self.beta, self.fn.w, self.fn.b)
        # Generic fn: tiled LayerNorm kernel, then call fn.
        return self.fn(layernorm(x, self.gamma, self.beta), **kwargs)


def reference_prenorm(x, gamma, beta, w, b, compute_dtype=None):
    """Pure-JAX reference for correctness checking."""
    mean = jnp.mean(x, axis=-1, keepdims=True)
    var = jnp.mean((x - mean) ** 2, axis=-1, keepdims=True)
    y = (x - mean) * jax.lax.rsqrt(var + EPS) * gamma + beta
    if compute_dtype is not None:
        y = y.astype(compute_dtype)
        w = w.astype(compute_dtype)
    out = jnp.einsum("bsh,hk->bsk", y, w, preferred_element_type=jnp.float32)
    return (out + b).astype(x.dtype)


if __name__ == "__main__":
    key = jax.random.PRNGKey(0)
    B, S, H = 2, 8, 32  # batch, seq, hidden_dim

    kx, kw, kb = jax.random.split(key, 3)
    x = jax.random.normal(kx, (B, S, H), jnp.float32)

    # Deterministic params for the wrapped fn (a Linear H -> H).
    w = jax.random.normal(kw, (H, H), jnp.float32) * 0.02
    b = jax.random.normal(kb, (H,), jnp.float32) * 0.01

    module = PreNorm(H, Linear(w, b))

    # 1) Default (bf16 MXU) fused path vs. a bf16-aware reference.
    out = jax.block_until_ready(module(x))
    ref_bf16 = reference_prenorm(x, module.gamma, module.beta, w, b,
                                 compute_dtype=jnp.bfloat16)
    assert out.shape == (B, S, H), out.shape
    assert jnp.allclose(out, ref_bf16, atol=1e-2, rtol=1e-2), float(
        jnp.max(jnp.abs(out - ref_bf16))
    )

    # 2) f32-compute fused path vs. the f32 reference (tight tolerance).
    out_f32 = jax.block_until_ready(
        prenorm_linear(x, module.gamma, module.beta, w, b,
                       compute_dtype=jnp.float32)
    )
    ref_f32 = reference_prenorm(x, module.gamma, module.beta, w, b)
    assert jnp.allclose(out_f32, ref_f32, atol=1e-4, rtol=1e-4), float(
        jnp.max(jnp.abs(out_f32 - ref_f32))
    )

    # 3) Standalone tiled LayerNorm kernel (generic-fn path).
    y = jax.block_until_ready(layernorm(x, module.gamma, module.beta))
    mean = jnp.mean(x, axis=-1, keepdims=True)
    var = jnp.mean((x - mean) ** 2, axis=-1, keepdims=True)
    y_ref = (x - mean) * jax.lax.rsqrt(var + EPS) * module.gamma + module.beta
    assert jnp.allclose(y, y_ref, atol=1e-4, rtol=1e-4), float(
        jnp.max(jnp.abs(y - y_ref))
    )

    print("KERNEL_OK")
</pallas_src>

<mosaic_0001>
module attributes {stable_mosaic.version = 11 : i64} {
  func.func @_prenorm_linear_kernel(%arg0: i32, %arg1: i32, %arg2: memref<16x32xf32, #tpu.memory_space<vmem>>, %arg3: memref<1x32xf32, #tpu.memory_space<vmem>>, %arg4: memref<1x32xf32, #tpu.memory_space<vmem>>, %arg5: memref<32x128xbf16, #tpu.memory_space<vmem>>, %arg6: memref<1x128xf32, #tpu.memory_space<vmem>>, %arg7: memref<16x128xf32, #tpu.memory_space<vmem>>, %arg8: memref<16x32xbf16, #tpu.memory_space<vmem>>) attributes {dimension_semantics = [#tpu.dimension_semantics<parallel>, #tpu.dimension_semantics<arbitrary>], iteration_bounds = array<i64: 1, 1>, scalar_prefetch = 0 : i64, scratch_operands = 1 : i64, tpu.core_type = #tpu.core_type<tc>, window_params = [{transform_indices = @transform_0, window_bounds = array<i64: 16, 32>}, {pipeline_mode = #tpu.pipeline_mode<synchronous>, transform_indices = @transform_1, window_bounds = array<i64: 1, 32>}, {pipeline_mode = #tpu.pipeline_mode<synchronous>, transform_indices = @transform_2, window_bounds = array<i64: 1, 32>}, {transform_indices = @transform_3, window_bounds = array<i64: 32, 128>}, {transform_indices = @transform_4, window_bounds = array<i64: 1, 128>}, {transform_indices = @transform_5, window_bounds = array<i64: 16, 128>}]} {
    %c0_i32 = arith.constant 0 : i32
    %0 = arith.cmpi eq, %arg1, %c0_i32 : i32
    %1 = arith.extui %0 : i1 to i32
    %c0_i32_0 = arith.constant 0 : i32
    %2 = arith.cmpi ne, %1, %c0_i32_0 : i32
    scf.if %2 {
      %c0_8 = arith.constant 0 : index
      %c0_9 = arith.constant 0 : index
      %10 = vector.load %arg2[%c0_8, %c0_9] : memref<16x32xf32, #tpu.memory_space<vmem>>, vector<16x32xf32>
      %cst_10 = arith.constant dense<0.000000e+00> : vector<16xf32>
      %11 = vector.multi_reduction <add>, %10, %cst_10 [1] : vector<16x32xf32> to vector<16xf32>
      %12 = vector.shape_cast %11 : vector<16xf32> to vector<16x1xf32>
      %13 = arith.mulf %10, %10 : vector<16x32xf32>
      %cst_11 = arith.constant dense<0.000000e+00> : vector<16xf32>
      %14 = vector.multi_reduction <add>, %13, %cst_11 [1] : vector<16x32xf32> to vector<16xf32>
      %15 = vector.shape_cast %14 : vector<16xf32> to vector<16x1xf32>
      %cst_12 = arith.constant 3.125000e-02 : f32
      %16 = vector.broadcast %cst_12 : f32 to vector<16x1xf32>
      %17 = arith.mulf %12, %16 : vector<16x1xf32>
      %cst_13 = arith.constant 3.125000e-02 : f32
      %18 = vector.broadcast %cst_13 : f32 to vector<16x1xf32>
      %19 = arith.mulf %15, %18 : vector<16x1xf32>
      %20 = arith.mulf %17, %17 : vector<16x1xf32>
      %21 = arith.subf %19, %20 : vector<16x1xf32>
      %cst_14 = arith.constant 0.000000e+00 : f32
      %22 = vector.broadcast %cst_14 : f32 to vector<16x1xf32>
      %23 = arith.maximumf %21, %22 : vector<16x1xf32>
      %24 = vector.broadcast %17 : vector<16x1xf32> to vector<16x32xf32>
      %25 = arith.subf %10, %24 : vector<16x32xf32>
      %cst_15 = arith.constant 9.99999974E-6 : f32
      %26 = vector.broadcast %cst_15 : f32 to vector<16x1xf32>
      %27 = arith.addf %23, %26 : vector<16x1xf32>
      %28 = math.rsqrt %27 : vector<16x1xf32>
      %29 = vector.broadcast %28 : vector<16x1xf32> to vector<16x32xf32>
      %30 = arith.mulf %25, %29 : vector<16x32xf32>
      %c0_16 = arith.constant 0 : index
      %c0_17 = arith.constant 0 : index
      %31 = vector.load %arg3[%c0_16, %c0_17] : memref<1x32xf32, #tpu.memory_space<vmem>>, vector<1x32xf32>
      %32 = vector.broadcast %31 : vector<1x32xf32> to vector<16x32xf32>
      %33 = arith.mulf %30, %32 : vector<16x32xf32>
      %c0_18 = arith.constant 0 : index
      %c0_19 = arith.constant 0 : index
      %34 = vector.load %arg4[%c0_18, %c0_19] : memref<1x32xf32, #tpu.memory_space<vmem>>, vector<1x32xf32>
      %35 = vector.broadcast %34 : vector<1x32xf32> to vector<16x32xf32>
      %36 = arith.addf %33, %35 : vector<16x32xf32>
      %37 = arith.truncf %36 : vector<16x32xf32> to vector<16x32xbf16>
      %c0_20 = arith.constant 0 : index
      %c0_21 = arith.constant 0 : index
      %38 = vector.load %arg8[%c0_20, %c0_21] : memref<16x32xbf16, #tpu.memory_space<vmem>>, vector<16x32xbf16>
      tpu.vector_store %arg8[%c0_20, %c0_21], %37 {strides = array<i32>} : memref<16x32xbf16, #tpu.memory_space<vmem>>, vector<16x32xbf16>,
    } else {
    }
    %c0 = arith.constant 0 : index
    %c0_1 = arith.constant 0 : index
    %3 = vector.load %arg8[%c0, %c0_1] : memref<16x32xbf16, #tpu.memory_space<vmem>>, vector<16x32xbf16>
    %c0_2 = arith.constant 0 : index
    %c0_3 = arith.constant 0 : index
    %4 = vector.load %arg5[%c0_2, %c0_3] : memref<32x128xbf16, #tpu.memory_space<vmem>>, vector<32x128xbf16>
    %cst = arith.constant dense<0.000000e+00> : vector<16x128xf32>
    %5 = tpu.matmul %3, %4, %cst {dimension_numbers = #tpu.dot_dimension_numbers<[1], [0], [0], [1], [0, 0, 1, 1], [], []>} : vector<16x32xbf16>, vector<32x128xbf16>, vector<16x128xf32> -> vector<16x128xf32>
    %c0_4 = arith.constant 0 : index
    %c0_5 = arith.constant 0 : index
    %6 = vector.load %arg6[%c0_4, %c0_5] : memref<1x128xf32, #tpu.memory_space<vmem>>, vector<1x128xf32>
    %7 = vector.broadcast %6 : vector<1x128xf32> to vector<16x128xf32>
    %8 = arith.addf %5, %7 : vector<16x128xf32>
    %c0_6 = arith.constant 0 : index
    %c0_7 = arith.constant 0 : index
    %9 = vector.load %arg7[%c0_6, %c0_7] : memref<16x128xf32, #tpu.memory_space<vmem>>, vector<16x128xf32>
    tpu.vector_store %arg7[%c0_6, %c0_7], %8 {strides = array<i32>} : memref<16x128xf32, #tpu.memory_space<vmem>>, vector<16x128xf32>,
    return
  }
  func.func @transform_0(%arg0: i32, %arg1: i32) -> (i32, i32) {
    %c0_i32 = arith.constant 0 : i32
    %c0_i32_0 = arith.constant 0 : i32
    return %arg0, %c0_i32 : i32, i32
  }
  func.func @transform_1(%arg0: i32, %arg1: i32) -> (i32, i32) {
    %c0_i32 = arith.constant 0 : i32
    %c0_i32_0 = arith.constant 0 : i32
    %c0_i32_1 = arith.constant 0 : i32
    return %c0_i32, %c0_i32_0 : i32, i32
  }
  func.func @transform_2(%arg0: i32, %arg1: i32) -> (i32, i32) {
    %c0_i32 = arith.constant 0 : i32
    %c0_i32_0 = arith.constant 0 : i32
    %c0_i32_1 = arith.constant 0 : i32
    return %c0_i32, %c0_i32_0 : i32, i32
  }
  func.func @transform_3(%arg0: i32, %arg1: i32) -> (i32, i32) {
    %c0_i32 = arith.constant 0 : i32
    %c0_i32_0 = arith.constant 0 : i32
    return %c0_i32, %arg1 : i32, i32
  }
  func.func @transform_4(%arg0: i32, %arg1: i32) -> (i32, i32) {
    %c0_i32 = arith.constant 0 : i32
    %c0_i32_0 = arith.constant 0 : i32
    return %c0_i32, %arg1 : i32, i32
  }
  func.func @transform_5(%arg0: i32, %arg1: i32) -> (i32, i32) {
    %c0_i32 = arith.constant 0 : i32
    return %arg0, %arg1 : i32, i32
  }
}

</mosaic_0001>

<bundles_post_ra>
// kernel: tpu_custom_call.1
= control target key start
LH: loop header
LB: loop body
LE: loop exit
PB: predicated region body
PF: predicated region fallthrough
CT: control target
= control target key end

     0   :  { %10 = vsyncpa [#allocation4], 0  ;;  %s398_s0 = inlined_call_operand.hbm [shape: f32[16,32], index: 0, kind: input, shape index: {}]   ;;  %s399_s1 = inlined_call_operand.vmem [shape: f32[1,32], index: 1, kind: input, shape index: {}]   ;;  %s400_s2 = inlined_call_operand.vmem [shape: f32[1,32], index: 2, kind: input, shape index: {}]   ;;  %s401_s3 = inlined_call_operand.hbm [shape: bf16[32,128], index: 3, kind: input, shape index: {}]   ;;  %s402_s4 = inlined_call_operand.vmem [shape: f32[1,128], index: 4, kind: input, shape index: {}]   ;;  %s403_s5 = inlined_call_operand.hbm [shape: f32[16,128], index: 5, kind: output, shape index: {}]  }
   0x1   :  { %11 = vsyncpa [#allocation7], 0 }
   0x2   :  { %12 = vsyncpa [#allocation5], 0  ;;  %s302_s18 = smov [#allocation3]   ;;  %s230_s22 = scalar_lea.hbm %s398_s0, 256 }
   0x3   :  { %s18_s19 = sshll.u32 %s302_s18, 4  ;;  %p231_p0 = scmp.ne.s32.totalorder %s398_s0, %s230_s22  ;;  %s19_s19 = int_to_ptr.vmem [resolvable:$true] %s18_s19 }
   0x4   :  { %p234_p1 = scmp.lt.u32.totalorder %s230_s22, %s398_s0 }
   0x6   :  { %p236_p2 = pnand %p234_p1, %p231_p0 }
   0x8   :  { %239 = shalt.err (!%p236_p2)
}
   0x9   :  { %s240_s27 = scalar_lea.vmem %s19_s19, 256  ;;  %p245_p4 = scmp.lt.s32.totalorder %s19_s19, %s19_s19 }
   0xa   :  { %p241_p3 = scmp.ne.s32.totalorder %s19_s19, %s240_s27  ;;  %p246_p5 = scmp.lt.s32.totalorder %s240_s27, %s240_s27 }
   0xc   :  { %p247_p6 = por %p246_p5, %p245_p4 }
   0xe   :  { %p248_p7 = pnand %p247_p6, %p241_p3 }
  0x10   :  { %251 = shalt.err (!%p248_p7)
}
  0x11   :  { %s303_s28 = smov 128   ;;  %s304_s29 = smov 8  }
  0x12   :  { %24 = dma.hbm_to_vmem [thread:$0]  %s398_s0, 256, %s19_s19, [#allocation4], %s303_s28, %s303_s28, %s304_s29  }
  0x13   :  { %s305_s7 = smov [#allocation6]   ;;  %s252_s11 = scalar_lea.hbm %s401_s3, 256 }
  0x14   :  { %s34_s8 = sshll.u32 %s305_s7, 4  ;;  %p253_p8 = scmp.ne.s32.totalorder %s401_s3, %s252_s11  ;;  %s35_s8 = int_to_ptr.vmem [resolvable:$true] %s34_s8 }
  0x15   :  { %p256_p9 = scmp.lt.u32.totalorder %s252_s11, %s401_s3 }
  0x17   :  { %p258_p10 = pnand %p256_p9, %p253_p8 }
  0x19   :  { %261 = shalt.err (!%p258_p10)
}
  0x1a   :  { %s262_s16 = scalar_lea.vmem %s35_s8, 256  ;;  %p267_p12 = scmp.lt.s32.totalorder %s35_s8, %s35_s8 }
  0x1b   :  { %p263_p11 = scmp.ne.s32.totalorder %s35_s8, %s262_s16  ;;  %p268_p13 = scmp.lt.s32.totalorder %s262_s16, %s262_s16 }
  0x1d   :  { %p269_p0 = por %p268_p13, %p267_p12 }
  0x1f   :  { %p270_p1 = pnand %p269_p0, %p263_p11 }
  0x21   :  { %273 = shalt.err (!%p270_p1)
}
  0x22   :  { %s306_s0 = smov 64   ;;  %s307_s17 = smov 4  }
  0x23   :  { %40 = dma.hbm_to_vmem [thread:$0]  %s401_s3, 256, %s35_s8, [#allocation7], %s306_s0, %s306_s0, %s307_s17  }
  0x24   :  { %296 = dma.done.wait [#allocation4], 256  }
  0x25   :  { %297 = vsyncadd [#allocation4], 4294967040 }
  0x26   :  { %298 = dma.done.wait [#allocation7], 256  }
  0x27   :  { %299 = vsyncadd [#allocation7], 4294967040  ;;  %vm56_vm0 = vcmask 261120   ;;  %v54_v0 = vld [vmem:[#allocation3] sm:$0xff]  ;;  %v55_v1 = vld [vmem:[#allocation3 + $0x8] sm:$0xff]  ;;  %v308_v9 = vmov 0.0  }
  0x28   :  { %v57_v2 = vsel %vm56_vm0, %v54_v0, 0.0  ;;  %v63_v3 = vmul.f32 %v54_v0, %v54_v0  ;;  %v64_v4 = vmul.f32 %v55_v1, %v55_v1  ;;  %v60_v6 = vsel %vm56_vm0, %v55_v1, 0.0  ;;  %v224_v8 = vld [vmem:[#allocation6] sm:$0xff]   ;;  %207 = vmatprep.subr.bf16.mxu0 %v308_v9  ;;  %v225_v10 = vld [vmem:[#allocation6 + $0x8] sm:$0xff]  }
  0x29   :  { %58 = vadd.xlane.f32.xlu0 %v57_v2  ;;  %208 = vmatpush3.bf16.msra.mxu0 %v224_v8  ;;  %vm309_vm1 = vmmov 0   ;;  %v198_v30 = vld [vmem:[%s399_s1] ss:$0 sm:$0xff]  ;;  %s310_s1 = smov [#allocation8]  }
  0x2a   :  { %v65_v5 = vsel %vm56_vm0, %v63_v3, 0.0  ;;  %v68_v7 = vsel %vm56_vm0, %v64_v4, 0.0  ;;  %211 = vmatprep.mubr.msk.bf16.mxu0 %vm309_vm1, %v308_v9  ;;  %209 = vmatprep.subr.bf16.mxu0 %v308_v9  ;;  %v199_v35 = vld [vmem:[%s400_s2] ss:$0 sm:$0xff]  ;;  %s185_s25 = sshll.u32 %s310_s1, 4  ;;  %s186_s25 = int_to_ptr.vmem [resolvable:$true] %s185_s25 }
  0x2b   :  { %66 = vadd.xlane.f32.xlu1 %v65_v5  ;;  %v200_v41 = vld [vmem:[%s402_s4] ss:$0 sm:$0xff]  ;;  %s274_s2 = scalar_lea.vmem %s186_s25, 256  ;;  %p279_p3 = scmp.lt.s32.totalorder %s186_s25, %s186_s25 }
  0x2c   :  { %p275_p2 = scmp.ne.s32.totalorder %s186_s25, %s274_s2  ;;  %p280_p4 = scmp.lt.s32.totalorder %s274_s2, %s274_s2 }
  0x2d   :  { %61 = vadd.xlane.f32.xlu0 %v60_v6  ;;  %210 = vmatpush3.bf16.msra.mxu0 %v225_v10 }
  0x2e   :  { %p281_p5 = por %p280_p4, %p279_p3 }
  0x2f   :  { %69 = vadd.xlane.f32.xlu1 %v68_v7 }
  0x30   :  { %p282_p6 = pnand %p281_p5, %p275_p2 }
  0xb6   :  { %v59_v11 = vpop.xlane.xlu0 %58 }
  0xb7   :  { %v71_v12 = vmul.f32 0.03125, %v59_v11 }
  0xb8   :  { %v67_v13 = vpop.xlane.xlu1 %66 }
  0xb9   :  { %v75_v14 = vmul.f32 %v71_v12, %v71_v12  ;;  %v73_v15 = vmul.f32 0.03125, %v67_v13  ;;  %v81_v27 = vsub.f32 %v54_v0, %v71_v12 }
  0xba   :  { %v62_v16 = vpop.xlane.xlu0 %61 }
  0xbb   :  { %v77_v17 = vsub.f32 %v73_v15, %v75_v14  ;;  %v72_v18 = vmul.f32 0.03125, %v62_v16 }
  0xbc   :  { %v70_v19 = vpop.xlane.xlu1 %69 }
  0xbd   :  { %v79_v20 = vmax.f32 %v77_v17, 0.0  ;;  %v76_v21 = vmul.f32 %v72_v18, %v72_v18  ;;  %v74_v22 = vmul.f32 0.03125, %v70_v19  ;;  %v82_v31 = vsub.f32 %v55_v1, %v72_v18 }
  0xbf   :  { %v83_v23 = vadd.f32 1e-05, %v79_v20  ;;  %v78_v24 = vsub.f32 %v74_v22, %v76_v21 }
  0xc1   :  { %226 = vrsqrt.f32 %v83_v23  ;;  %v80_v25 = vmax.f32 %v78_v24, 0.0 }
  0xc3   :  { %v84_v26 = vadd.f32 1e-05, %v80_v25 }
  0xc5   :  { %228 = vrsqrt.f32 %v84_v26 }
  0xcb   :  { %v227_v28 = vpop.eup %226 }
  0xcc   :  { %v87_v29 = vmul.f32 %v227_v28, %v81_v27 }
  0xce   :  { %v96_v33 = vmul.f32 %v198_v30, %v87_v29 }
  0xcf   :  { %v229_v32 = vpop.eup %228 }
  0xd0   :  { %v88_v34 = vmul.f32 %v229_v32, %v82_v31  ;;  %v105_v37 = vadd.f32 %v199_v35, %v96_v33 }
  0xd2   :  { %v97_v36 = vmul.f32 %v198_v30, %v88_v34 }
  0xd4   :  { %v106_v38 = vadd.f32 %v199_v35, %v97_v36 }
  0xd6   :  { %v107_v39 = vpack.c.bf16 %v106_v38, %v105_v37 }
  0xd8   :  { %108 = vst.msk [vmem:[#allocation2] sm:$0xff] %vm56_vm0, %v107_v39 }
  0xdf   :  { %v109_v40 = vld [vmem:[#allocation2] sm:$0xff] }
  0xe0   :  { %212 = vmatmul.mubr.msk.bf16.vlgmr.msra.gmra.mrb[0].mxu0 %vm56_vm0, %v109_v40 }
 0x1b3   :  { %v171_v42 = vpop.f32.mrb[0].mxu0 }
 0x1b4   :  { %v172_v43 = vadd.f32 %v200_v41, %v171_v42  ;;  %v213_v44 = vpop.f32.mrb[1].mxu0 }
 0x1b5   :  { %v174_v45 = vpop.f32.mrb[2].mxu0 }
 0x1b6   :  { %178 = vst [vmem:[#allocation8] sm:$0xff] %v172_v43  ;;  %v175_v46 = vadd.f32 %v200_v41, %v174_v45  ;;  %v214_v47 = vpop.f32.mrb[3].mxu0 }
 0x1b8   :  { %179 = vst [vmem:[#allocation8 + $0x8] sm:$0xff] %v175_v46 }
 0x1b9   :  { %285 = shalt.err (!%p282_p6)
}
 0x1ba   :  { %s286_s27 = scalar_lea.hbm %s403_s5, 256 }
 0x1bb   :  { %p287_p7 = scmp.ne.s32.totalorder %s403_s5, %s286_s27  ;;  %p290_p8 = scmp.lt.u32.totalorder %s286_s27, %s403_s5 }
 0x1bd   :  { %p292_p9 = pnand %p290_p8, %p287_p7 }
 0x1bf   :  { %295 = shalt.err (!%p292_p9)
}
 0x1c0   :  { %191 = dma.vmem_to_hbm [thread:$0]  %s186_s25, 256, %s403_s5, [#allocation5], %s303_s28, %s303_s28, %s304_s29  }
 0x1c1   :  { %300 = dma.done.wait [#allocation5], 256  }
 0x1c2   :  { %301 = vsyncadd [#allocation5], 4294967040 }
 0x1c3   :  { %195 = vsyncpa [#allocation4], 1 }
 0x1c4   :  { %196 = vsyncpa [#allocation7], 1 }
 0x1c5   :  { %197 = vsyncpa [#allocation5], 1 }

</bundles_post_ra>
